<compile_context>
chip_gen: v7x
topology: tpu7x:2x2x1
jax: 0.10.0
libtpu: 0.0.40
codegen_flags: <defaults>
</compile_context>

<pallas_src>
import math

import jax
import jax.numpy as jnp
import numpy as np
from jax import lax
from jax.experimental import pallas as pl
from jax.experimental.pallas import tpu as pltpu

# ---------------- model hyperparameters (small, consistent with the module) ----------------
BATCH = 2
SEQ = 8
EMBED_DIM = 32
NUM_HEADS = 4
FF_DIM = 64
HEAD_DIM = EMBED_DIM // NUM_HEADS
LN_EPS = 1e-5
NEG_INF = -1e30


# --------------------------------- Pallas kernel -------------------------------------------
def transformer_layer_kernel(
    x_ref,      # (B*S, E)   f32 — all batch rows folded into the sublane dim
    bias_ref,   # (B*S, B*S) f32 — additive attention bias (0 valid / NEG_INF cross-batch or padded)
    wslab_ref,  # (E, 4E+F)  bf16 — [wqkv (Q pre-scaled by 1/sqrt(D)) | wo | w1]
    w2_ref,     # (F, E)     bf16
    pslab_ref,  # (8, 128)   f32 rows: [bqkv(96) | b1(64) | bo | b2 | g1 | be1 | g2 | be2]
    o_ref,      # (B*S, E)   f32
    ctx_scr,    # (B*S, E)   f32 VMEM scratch — per-head context accumulator
):
    E = EMBED_DIM
    H, D, F = NUM_HEADS, HEAD_DIM, FF_DIM

    x = x_ref[...]                                   # (BS, E) f32
    bias = bias_ref[...]                             # (BS, BS) f32

    # ---- hoist small parameters from the packed slab (loaded once) ----
    pslab = pslab_ref[...]
    bqkv = pslab[0:1, 0:3 * E]
    b1 = pslab[1:2, 0:F]
    bo = pslab[2:3, 0:E]
    b2 = pslab[3:4, 0:E]
    g1, be1 = pslab[4:5, 0:E], pslab[5:6, 0:E]
    g2, be2 = pslab[6:7, 0:E], pslab[7:8, 0:E]

    wslab = wslab_ref[...]                           # (E, 192) bf16
    wqkv = wslab[:, 0:3 * E]
    wo = wslab[:, 3 * E:4 * E]
    w1 = wslab[:, 4 * E:4 * E + F]

    # ---- fused QKV projection: one bf16 MXU op, f32 accumulation ----
    x_bf = x.astype(jnp.bfloat16)
    qkv = jnp.dot(x_bf, wqkv, preferred_element_type=jnp.float32) + bqkv   # (BS, 3E) f32
    qkv_bf = qkv.astype(jnp.bfloat16)
    q = qkv_bf[:, 0:E]          # already scaled by 1/sqrt(D) via the packed weight/bias
    k = qkv_bf[:, E:2 * E]
    v = qkv_bf[:, 2 * E:3 * E]

    # ---- attention, batch merged: per head one (BS,BS) score dot + one (BS,D) p@v dot ----
    nt_dims = (((1,), (1,)), ((), ()))    # contract last dims -> q @ k^T, no transpose node
    for h in range(H):                    # H=4, unrolled at trace time
        c0 = h * D
        qh = q[:, c0:c0 + D]
        kh = k[:, c0:c0 + D]
        vh = v[:, c0:c0 + D]
        s = lax.dot_general(qh, kh, nt_dims,
                            preferred_element_type=jnp.float32)            # (BS, BS) f32
        s = s + bias
        m = jnp.max(s, axis=-1, keepdims=True)
        p = jnp.exp(s - m)
        p = p * pl.reciprocal(jnp.sum(p, axis=-1, keepdims=True), approx=True)
        ctx_scr[:, c0:c0 + D] = jnp.dot(p.astype(jnp.bfloat16), vh,
                                        preferred_element_type=jnp.float32)  # (BS, D)
    ctx = ctx_scr[...]                                                       # (BS, E) f32

    attn_out = jnp.dot(ctx.astype(jnp.bfloat16), wo,
                       preferred_element_type=jnp.float32) + bo

    # ---- residual + LayerNorm (f32 stats) ----
    def layer_norm(val, gamma, beta):
        mu = jnp.mean(val, axis=-1, keepdims=True)
        var = jnp.mean((val - mu) ** 2, axis=-1, keepdims=True)
        return (val - mu) * lax.rsqrt(var + LN_EPS) * gamma + beta

    x1 = layer_norm(x + attn_out, g1, be1)

    # ---- feed-forward network (bf16 MXU operands, f32 accumulate / elementwise) ----
    hmid = jnp.maximum(
        jnp.dot(x1.astype(jnp.bfloat16), w1, preferred_element_type=jnp.float32) + b1, 0.0)
    ff = jnp.dot(hmid.astype(jnp.bfloat16), w2_ref[...],
                 preferred_element_type=jnp.float32) + b2

    x2 = layer_norm(x1 + ff, g2, be2)
    o_ref[...] = x2.astype(o_ref.dtype)


# ------------------------------ one-time parameter packing ---------------------------------
def pack_params(p):
    """Build the fused/packed operands ONCE (outside the per-call dispatch path)."""
    E, F, D = EMBED_DIM, FF_DIM, HEAD_DIM
    scale = 1.0 / math.sqrt(D)

    wqkv = jnp.concatenate([p["wq"] * scale, p["wk"], p["wv"]], axis=1)        # (E, 3E)
    wslab = jnp.concatenate([wqkv, p["wo"], p["w1"]], axis=1).astype(jnp.bfloat16)  # (E, 4E+F)
    w2 = p["w2"].astype(jnp.bfloat16)                                          # (F, E)

    bqkv = jnp.concatenate([p["bq"] * scale, p["bk"], p["bv"]], axis=1)        # (1, 3E)

    def row(vec):
        return jnp.pad(vec, ((0, 0), (0, 128 - vec.shape[1])))

    pslab = jnp.concatenate(
        [row(bqkv), row(p["b1"]), row(p["bo"]), row(p["b2"]),
         row(p["g1"]), row(p["be1"]), row(p["g2"]), row(p["be2"])], axis=0)    # (8, 128)

    return {"wslab": wslab, "w2": w2, "pslab": pslab.astype(jnp.float32)}


# --------------------------------- wrapper (jitted) -----------------------------------------
def _transformer_layer_impl(x, attention_mask, packed):
    """x: (B, S, E) f32; attention_mask: (B, S), 1 = valid token; packed: from pack_params."""
    B, S, E = x.shape
    BS = B * S

    # Additive attention bias: NEG_INF on cross-batch blocks and on padded keys.
    batch_ids = jnp.arange(BS) // S
    same_batch = batch_ids[:, None] == batch_ids[None, :]                      # constant-folded
    key_valid = (attention_mask > 0.5).reshape(1, BS)
    attn_bias = jnp.where(same_batch & key_valid, 0.0, NEG_INF).astype(jnp.float32)  # (BS, BS)

    x2d = x.reshape(BS, E)

    vmem = pl.BlockSpec(memory_space=pltpu.MemorySpace.VMEM)
    out = pl.pallas_call(
        transformer_layer_kernel,
        out_shape=jax.ShapeDtypeStruct((BS, E), jnp.float32),
        in_specs=[vmem] * 5,
        out_specs=vmem,
        scratch_shapes=[pltpu.VMEM((BS, E), jnp.float32)],
    )(x2d, attn_bias, packed["wslab"], packed["w2"], packed["pslab"])
    return out.reshape(B, S, E)


transformer_layer = jax.jit(_transformer_layer_impl)


# ------------------------------ deterministic params ---------------------------------------
def init_params(key):
    ks = jax.random.split(key, 16)
    E, F = EMBED_DIM, FF_DIM
    s_e = 1.0 / math.sqrt(E)
    s_f = 1.0 / math.sqrt(F)
    return {
        # attention in-proj (stored (in, out) = transpose of PyTorch's (out, in))
        "wq": jax.random.uniform(ks[0], (E, E), jnp.float32, -s_e, s_e),
        "wk": jax.random.uniform(ks[1], (E, E), jnp.float32, -s_e, s_e),
        "wv": jax.random.uniform(ks[2], (E, E), jnp.float32, -s_e, s_e),
        "bq": jax.random.uniform(ks[3], (1, E), jnp.float32, -s_e, s_e),
        "bk": jax.random.uniform(ks[4], (1, E), jnp.float32, -s_e, s_e),
        "bv": jax.random.uniform(ks[5], (1, E), jnp.float32, -s_e, s_e),
        # attention out-proj
        "wo": jax.random.uniform(ks[6], (E, E), jnp.float32, -s_e, s_e),
        "bo": jax.random.uniform(ks[7], (1, E), jnp.float32, -s_e, s_e),
        # LayerNorm1
        "g1": jnp.ones((1, E), jnp.float32),
        "be1": jnp.zeros((1, E), jnp.float32),
        # FFN
        "w1": jax.random.uniform(ks[8], (E, F), jnp.float32, -s_e, s_e),
        "b1": jax.random.uniform(ks[9], (1, F), jnp.float32, -s_e, s_e),
        "w2": jax.random.uniform(ks[10], (F, E), jnp.float32, -s_f, s_f),
        "b2": jax.random.uniform(ks[11], (1, E), jnp.float32, -s_f, s_f),
        # LayerNorm2
        "g2": jnp.ones((1, E), jnp.float32),
        "be2": jnp.zeros((1, E), jnp.float32),
    }


# --------------------------------- pure-JAX reference (f32) --------------------------------
def reference(x, attention_mask, p):
    B, S, E = x.shape
    H, D = NUM_HEADS, HEAD_DIM

    def ln(v, g, b):
        mu = v.mean(-1, keepdims=True)
        var = ((v - mu) ** 2).mean(-1, keepdims=True)
        return (v - mu) / jnp.sqrt(var + LN_EPS) * g + b

    q = x @ p["wq"] + p["bq"]
    k = x @ p["wk"] + p["bk"]
    v = x @ p["wv"] + p["bv"]
    q = q.reshape(B, S, H, D).transpose(0, 2, 1, 3)
    k = k.reshape(B, S, H, D).transpose(0, 2, 1, 3)
    v = v.reshape(B, S, H, D).transpose(0, 2, 1, 3)
    scores = jnp.einsum("bhqd,bhkd->bhqk", q, k) / math.sqrt(D)
    valid = attention_mask[:, None, None, :] > 0.5
    scores = jnp.where(valid, scores, NEG_INF)
    w = jax.nn.softmax(scores, axis=-1)
    ctx = jnp.einsum("bhqk,bhkd->bhqd", w, v).transpose(0, 2, 1, 3).reshape(B, S, E)
    attn_out = ctx @ p["wo"] + p["bo"]
    x1 = ln(x + attn_out, p["g1"], p["be1"])
    ff = jnp.maximum(x1 @ p["w1"] + p["b1"], 0.0) @ p["w2"] + p["b2"]
    return ln(x1 + ff, p["g2"], p["be2"])


# ------------------------------------- main -------------------------------------------------
if __name__ == "__main__":
    key = jax.random.PRNGKey(0)
    k_x, k_p = jax.random.split(key)

    x = jax.random.normal(k_x, (BATCH, SEQ, EMBED_DIM), jnp.float32)
    # attention_mask semantics from the module: 1 = attend (None-equivalent when all ones)
    attention_mask = jnp.ones((BATCH, SEQ), jnp.float32)
    params = init_params(k_p)

    packed = pack_params(params)          # one-time packing, outside the dispatch path
    out = transformer_layer(x, attention_mask, packed)
    out = jax.block_until_ready(out)

    ref = reference(x, attention_mask, params)
    # Tolerance reflects bf16 MXU operands (f32 accumulation) + approx reciprocal in softmax;
    # with pure-f32 operands the kernel matched at 2e-3.
    np.testing.assert_allclose(np.asarray(out), np.asarray(ref), rtol=2e-2, atol=2e-2)
    assert out.shape == (BATCH, SEQ, EMBED_DIM)

    print("KERNEL_OK")
</pallas_src>

<mosaic_0001>
module attributes {stable_mosaic.version = 11 : i64} {
  func.func @transformer_layer_kernel(%arg0: memref<16x32xf32, #tpu.memory_space<vmem>>, %arg1: memref<16x16xf32, #tpu.memory_space<vmem>>, %arg2: memref<32x192xbf16, #tpu.memory_space<vmem>>, %arg3: memref<64x32xbf16, #tpu.memory_space<vmem>>, %arg4: memref<8x128xf32, #tpu.memory_space<vmem>>, %arg5: memref<16x32xf32, #tpu.memory_space<vmem>>, %arg6: memref<16x32xf32, #tpu.memory_space<vmem>>) attributes {dimension_semantics = [], scalar_prefetch = 0 : i64, scratch_operands = 1 : i64, tpu.core_type = #tpu.core_type<tc>} {
    %c0 = arith.constant 0 : index
    %c0_0 = arith.constant 0 : index
    %0 = vector.load %arg0[%c0, %c0_0] : memref<16x32xf32, #tpu.memory_space<vmem>>, vector<16x32xf32>
    %c0_1 = arith.constant 0 : index
    %c0_2 = arith.constant 0 : index
    %1 = vector.load %arg1[%c0_1, %c0_2] : memref<16x16xf32, #tpu.memory_space<vmem>>, vector<16x16xf32>
    %c0_3 = arith.constant 0 : index
    %c0_4 = arith.constant 0 : index
    %2 = vector.load %arg4[%c0_3, %c0_4] : memref<8x128xf32, #tpu.memory_space<vmem>>, vector<8x128xf32>
    %3 = vector.extract_strided_slice %2 {offsets = [0, 0], sizes = [1, 96], strides = [1, 1]} : vector<8x128xf32> to vector<1x96xf32>
    %4 = vector.extract_strided_slice %2 {offsets = [1, 0], sizes = [1, 64], strides = [1, 1]} : vector<8x128xf32> to vector<1x64xf32>
    %5 = vector.extract_strided_slice %2 {offsets = [2, 0], sizes = [1, 32], strides = [1, 1]} : vector<8x128xf32> to vector<1x32xf32>
    %6 = vector.extract_strided_slice %2 {offsets = [3, 0], sizes = [1, 32], strides = [1, 1]} : vector<8x128xf32> to vector<1x32xf32>
    %7 = vector.extract_strided_slice %2 {offsets = [4, 0], sizes = [1, 32], strides = [1, 1]} : vector<8x128xf32> to vector<1x32xf32>
    %8 = vector.extract_strided_slice %2 {offsets = [5, 0], sizes = [1, 32], strides = [1, 1]} : vector<8x128xf32> to vector<1x32xf32>
    %9 = vector.extract_strided_slice %2 {offsets = [6, 0], sizes = [1, 32], strides = [1, 1]} : vector<8x128xf32> to vector<1x32xf32>
    %10 = vector.extract_strided_slice %2 {offsets = [7, 0], sizes = [1, 32], strides = [1, 1]} : vector<8x128xf32> to vector<1x32xf32>
    %c0_5 = arith.constant 0 : index
    %c0_6 = arith.constant 0 : index
    %11 = vector.load %arg2[%c0_5, %c0_6] : memref<32x192xbf16, #tpu.memory_space<vmem>>, vector<32x192xbf16>
    %12 = vector.extract_strided_slice %11 {offsets = [0, 0], sizes = [32, 96], strides = [1, 1]} : vector<32x192xbf16> to vector<32x96xbf16>
    %13 = vector.extract_strided_slice %11 {offsets = [0, 96], sizes = [32, 32], strides = [1, 1]} : vector<32x192xbf16> to vector<32x32xbf16>
    %14 = vector.extract_strided_slice %11 {offsets = [0, 128], sizes = [32, 64], strides = [1, 1]} : vector<32x192xbf16> to vector<32x64xbf16>
    %15 = arith.truncf %0 : vector<16x32xf32> to vector<16x32xbf16>
    %cst = arith.constant dense<0.000000e+00> : vector<16x96xf32>
    %16 = tpu.matmul %15, %12, %cst {dimension_numbers = #tpu.dot_dimension_numbers<[1], [0], [0], [1], [0, 0, 1, 1], [], []>} : vector<16x32xbf16>, vector<32x96xbf16>, vector<16x96xf32> -> vector<16x96xf32>
    %17 = vector.broadcast %3 : vector<1x96xf32> to vector<16x96xf32>
    %18 = arith.addf %16, %17 : vector<16x96xf32>
    %19 = arith.truncf %18 : vector<16x96xf32> to vector<16x96xbf16>
    %20 = vector.extract_strided_slice %19 {offsets = [0, 0], sizes = [16, 32], strides = [1, 1]} : vector<16x96xbf16> to vector<16x32xbf16>
    %21 = vector.extract_strided_slice %19 {offsets = [0, 32], sizes = [16, 32], strides = [1, 1]} : vector<16x96xbf16> to vector<16x32xbf16>
    %22 = vector.extract_strided_slice %19 {offsets = [0, 64], sizes = [16, 32], strides = [1, 1]} : vector<16x96xbf16> to vector<16x32xbf16>
    %23 = vector.extract_strided_slice %20 {offsets = [0, 0], sizes = [16, 8], strides = [1, 1]} : vector<16x32xbf16> to vector<16x8xbf16>
    %24 = vector.extract_strided_slice %21 {offsets = [0, 0], sizes = [16, 8], strides = [1, 1]} : vector<16x32xbf16> to vector<16x8xbf16>
    %25 = vector.extract_strided_slice %22 {offsets = [0, 0], sizes = [16, 8], strides = [1, 1]} : vector<16x32xbf16> to vector<16x8xbf16>
    %cst_7 = arith.constant dense<0.000000e+00> : vector<16x16xf32>
    %26 = tpu.matmul %23, %24, %cst_7 {dimension_numbers = #tpu.dot_dimension_numbers<[1], [1], [0], [0], [0, 0, 1, 0], [], []>} : vector<16x8xbf16>, vector<16x8xbf16>, vector<16x16xf32> -> vector<16x16xf32>
    %27 = arith.addf %26, %1 : vector<16x16xf32>
    %cst_8 = arith.constant dense<0xFF800000> : vector<16xf32>
    %28 = vector.multi_reduction <maximumf>, %27, %cst_8 [1] : vector<16x16xf32> to vector<16xf32>
    %29 = vector.shape_cast %28 : vector<16xf32> to vector<16x1xf32>
    %30 = vector.broadcast %29 : vector<16x1xf32> to vector<16x16xf32>
    %31 = arith.subf %27, %30 : vector<16x16xf32>
    %32 = math.exp %31 : vector<16x16xf32>
    %cst_9 = arith.constant dense<0.000000e+00> : vector<16xf32>
    %33 = vector.multi_reduction <add>, %32, %cst_9 [1] : vector<16x16xf32> to vector<16xf32>
    %34 = vector.shape_cast %33 : vector<16xf32> to vector<16x1xf32>
    %35 = tpu.reciprocal %34 {approx = true} : vector<16x1xf32> -> vector<16x1xf32>
    %36 = vector.broadcast %35 : vector<16x1xf32> to vector<16x16xf32>
    %37 = arith.mulf %32, %36 : vector<16x16xf32>
    %38 = arith.truncf %37 : vector<16x16xf32> to vector<16x16xbf16>
    %cst_10 = arith.constant dense<0.000000e+00> : vector<16x8xf32>
    %39 = tpu.matmul %38, %25, %cst_10 {dimension_numbers = #tpu.dot_dimension_numbers<[1], [0], [0], [1], [0, 0, 1, 1], [], []>} : vector<16x16xbf16>, vector<16x8xbf16>, vector<16x8xf32> -> vector<16x8xf32>
    %c0_11 = arith.constant 0 : index
    %c0_12 = arith.constant 0 : index
    %40 = vector.load %arg6[%c0_11, %c0_12] : memref<16x32xf32, #tpu.memory_space<vmem>>, vector<16x8xf32>
    tpu.vector_store %arg6[%c0_11, %c0_12], %39 {strides = array<i32>} : memref<16x32xf32, #tpu.memory_space<vmem>>, vector<16x8xf32>,
    %41 = vector.extract_strided_slice %20 {offsets = [0, 8], sizes = [16, 8], strides = [1, 1]} : vector<16x32xbf16> to vector<16x8xbf16>
    %42 = vector.extract_strided_slice %21 {offsets = [0, 8], sizes = [16, 8], strides = [1, 1]} : vector<16x32xbf16> to vector<16x8xbf16>
    %43 = vector.extract_strided_slice %22 {offsets = [0, 8], sizes = [16, 8], strides = [1, 1]} : vector<16x32xbf16> to vector<16x8xbf16>
    %cst_13 = arith.constant dense<0.000000e+00> : vector<16x16xf32>
    %44 = tpu.matmul %41, %42, %cst_13 {dimension_numbers = #tpu.dot_dimension_numbers<[1], [1], [0], [0], [0, 0, 1, 0], [], []>} : vector<16x8xbf16>, vector<16x8xbf16>, vector<16x16xf32> -> vector<16x16xf32>
    %45 = arith.addf %44, %1 : vector<16x16xf32>
    %cst_14 = arith.constant dense<0xFF800000> : vector<16xf32>
    %46 = vector.multi_reduction <maximumf>, %45, %cst_14 [1] : vector<16x16xf32> to vector<16xf32>
    %47 = vector.shape_cast %46 : vector<16xf32> to vector<16x1xf32>
    %48 = vector.broadcast %47 : vector<16x1xf32> to vector<16x16xf32>
    %49 = arith.subf %45, %48 : vector<16x16xf32>
    %50 = math.exp %49 : vector<16x16xf32>
    %cst_15 = arith.constant dense<0.000000e+00> : vector<16xf32>
    %51 = vector.multi_reduction <add>, %50, %cst_15 [1] : vector<16x16xf32> to vector<16xf32>
    %52 = vector.shape_cast %51 : vector<16xf32> to vector<16x1xf32>
    %53 = tpu.reciprocal %52 {approx = true} : vector<16x1xf32> -> vector<16x1xf32>
    %54 = vector.broadcast %53 : vector<16x1xf32> to vector<16x16xf32>
    %55 = arith.mulf %50, %54 : vector<16x16xf32>
    %56 = arith.truncf %55 : vector<16x16xf32> to vector<16x16xbf16>
    %cst_16 = arith.constant dense<0.000000e+00> : vector<16x8xf32>
    %57 = tpu.matmul %56, %43, %cst_16 {dimension_numbers = #tpu.dot_dimension_numbers<[1], [0], [0], [1], [0, 0, 1, 1], [], []>} : vector<16x16xbf16>, vector<16x8xbf16>, vector<16x8xf32> -> vector<16x8xf32>
    %c0_17 = arith.constant 0 : index
    %c8 = arith.constant 8 : index
    %58 = vector.load %arg6[%c0_17, %c8] : memref<16x32xf32, #tpu.memory_space<vmem>>, vector<16x8xf32>
    tpu.vector_store %arg6[%c0_17, %c8], %57 {strides = array<i32>} : memref<16x32xf32, #tpu.memory_space<vmem>>, vector<16x8xf32>,
    %59 = vector.extract_strided_slice %20 {offsets = [0, 16], sizes = [16, 8], strides = [1, 1]} : vector<16x32xbf16> to vector<16x8xbf16>
    %60 = vector.extract_strided_slice %21 {offsets = [0, 16], sizes = [16, 8], strides = [1, 1]} : vector<16x32xbf16> to vector<16x8xbf16>
    %61 = vector.extract_strided_slice %22 {offsets = [0, 16], sizes = [16, 8], strides = [1, 1]} : vector<16x32xbf16> to vector<16x8xbf16>
    %cst_18 = arith.constant dense<0.000000e+00> : vector<16x16xf32>
    %62 = tpu.matmul %59, %60, %cst_18 {dimension_numbers = #tpu.dot_dimension_numbers<[1], [1], [0], [0], [0, 0, 1, 0], [], []>} : vector<16x8xbf16>, vector<16x8xbf16>, vector<16x16xf32> -> vector<16x16xf32>
    %63 = arith.addf %62, %1 : vector<16x16xf32>
    %cst_19 = arith.constant dense<0xFF800000> : vector<16xf32>
    %64 = vector.multi_reduction <maximumf>, %63, %cst_19 [1] : vector<16x16xf32> to vector<16xf32>
    %65 = vector.shape_cast %64 : vector<16xf32> to vector<16x1xf32>
    %66 = vector.broadcast %65 : vector<16x1xf32> to vector<16x16xf32>
    %67 = arith.subf %63, %66 : vector<16x16xf32>
    %68 = math.exp %67 : vector<16x16xf32>
    %cst_20 = arith.constant dense<0.000000e+00> : vector<16xf32>
    %69 = vector.multi_reduction <add>, %68, %cst_20 [1] : vector<16x16xf32> to vector<16xf32>
    %70 = vector.shape_cast %69 : vector<16xf32> to vector<16x1xf32>
    %71 = tpu.reciprocal %70 {approx = true} : vector<16x1xf32> -> vector<16x1xf32>
    %72 = vector.broadcast %71 : vector<16x1xf32> to vector<16x16xf32>
    %73 = arith.mulf %68, %72 : vector<16x16xf32>
    %74 = arith.truncf %73 : vector<16x16xf32> to vector<16x16xbf16>
    %cst_21 = arith.constant dense<0.000000e+00> : vector<16x8xf32>
    %75 = tpu.matmul %74, %61, %cst_21 {dimension_numbers = #tpu.dot_dimension_numbers<[1], [0], [0], [1], [0, 0, 1, 1], [], []>} : vector<16x16xbf16>, vector<16x8xbf16>, vector<16x8xf32> -> vector<16x8xf32>
    %c0_22 = arith.constant 0 : index
    %c16 = arith.constant 16 : index
    %76 = vector.load %arg6[%c0_22, %c16] : memref<16x32xf32, #tpu.memory_space<vmem>>, vector<16x8xf32>
    tpu.vector_store %arg6[%c0_22, %c16], %75 {strides = array<i32>} : memref<16x32xf32, #tpu.memory_space<vmem>>, vector<16x8xf32>,
    %77 = vector.extract_strided_slice %20 {offsets = [0, 24], sizes = [16, 8], strides = [1, 1]} : vector<16x32xbf16> to vector<16x8xbf16>
    %78 = vector.extract_strided_slice %21 {offsets = [0, 24], sizes = [16, 8], strides = [1, 1]} : vector<16x32xbf16> to vector<16x8xbf16>
    %79 = vector.extract_strided_slice %22 {offsets = [0, 24], sizes = [16, 8], strides = [1, 1]} : vector<16x32xbf16> to vector<16x8xbf16>
    %cst_23 = arith.constant dense<0.000000e+00> : vector<16x16xf32>
    %80 = tpu.matmul %77, %78, %cst_23 {dimension_numbers = #tpu.dot_dimension_numbers<[1], [1], [0], [0], [0, 0, 1, 0], [], []>} : vector<16x8xbf16>, vector<16x8xbf16>, vector<16x16xf32> -> vector<16x16xf32>
    %81 = arith.addf %80, %1 : vector<16x16xf32>
    %cst_24 = arith.constant dense<0xFF800000> : vector<16xf32>
    %82 = vector.multi_reduction <maximumf>, %81, %cst_24 [1] : vector<16x16xf32> to vector<16xf32>
    %83 = vector.shape_cast %82 : vector<16xf32> to vector<16x1xf32>
    %84 = vector.broadcast %83 : vector<16x1xf32> to vector<16x16xf32>
    %85 = arith.subf %81, %84 : vector<16x16xf32>
    %86 = math.exp %85 : vector<16x16xf32>
    %cst_25 = arith.constant dense<0.000000e+00> : vector<16xf32>
    %87 = vector.multi_reduction <add>, %86, %cst_25 [1] : vector<16x16xf32> to vector<16xf32>
    %88 = vector.shape_cast %87 : vector<16xf32> to vector<16x1xf32>
    %89 = tpu.reciprocal %88 {approx = true} : vector<16x1xf32> -> vector<16x1xf32>
    %90 = vector.broadcast %89 : vector<16x1xf32> to vector<16x16xf32>
    %91 = arith.mulf %86, %90 : vector<16x16xf32>
    %92 = arith.truncf %91 : vector<16x16xf32> to vector<16x16xbf16>
    %cst_26 = arith.constant dense<0.000000e+00> : vector<16x8xf32>
    %93 = tpu.matmul %92, %79, %cst_26 {dimension_numbers = #tpu.dot_dimension_numbers<[1], [0], [0], [1], [0, 0, 1, 1], [], []>} : vector<16x16xbf16>, vector<16x8xbf16>, vector<16x8xf32> -> vector<16x8xf32>
    %c0_27 = arith.constant 0 : index
    %c24 = arith.constant 24 : index
    %94 = vector.load %arg6[%c0_27, %c24] : memref<16x32xf32, #tpu.memory_space<vmem>>, vector<16x8xf32>
    tpu.vector_store %arg6[%c0_27, %c24], %93 {strides = array<i32>} : memref<16x32xf32, #tpu.memory_space<vmem>>, vector<16x8xf32>,
    %c0_28 = arith.constant 0 : index
    %c0_29 = arith.constant 0 : index
    %95 = vector.load %arg6[%c0_28, %c0_29] : memref<16x32xf32, #tpu.memory_space<vmem>>, vector<16x32xf32>
    %96 = arith.truncf %95 : vector<16x32xf32> to vector<16x32xbf16>
    %cst_30 = arith.constant dense<0.000000e+00> : vector<16x32xf32>
    %97 = tpu.matmul %96, %13, %cst_30 {dimension_numbers = #tpu.dot_dimension_numbers<[1], [0], [0], [1], [0, 0, 1, 1], [], []>} : vector<16x32xbf16>, vector<32x32xbf16>, vector<16x32xf32> -> vector<16x32xf32>
    %98 = vector.broadcast %5 : vector<1x32xf32> to vector<16x32xf32>
    %99 = arith.addf %97, %98 : vector<16x32xf32>
    %100 = arith.addf %0, %99 : vector<16x32xf32>
    %cst_31 = arith.constant dense<0.000000e+00> : vector<16xf32>
    %101 = vector.multi_reduction <add>, %100, %cst_31 [1] : vector<16x32xf32> to vector<16xf32>
    %102 = vector.shape_cast %101 : vector<16xf32> to vector<16x1xf32>
    %cst_32 = arith.constant 3.200000e+01 : f32
    %103 = vector.broadcast %cst_32 : f32 to vector<16x1xf32>
    %104 = arith.divf %102, %103 : vector<16x1xf32>
    %105 = vector.broadcast %104 : vector<16x1xf32> to vector<16x32xf32>
    %106 = arith.subf %100, %105 : vector<16x32xf32>
    %107 = arith.mulf %106, %106 : vector<16x32xf32>
    %cst_33 = arith.constant dense<0.000000e+00> : vector<16xf32>
    %108 = vector.multi_reduction <add>, %107, %cst_33 [1] : vector<16x32xf32> to vector<16xf32>
    %109 = vector.shape_cast %108 : vector<16xf32> to vector<16x1xf32>
    %cst_34 = arith.constant 3.200000e+01 : f32
    %110 = vector.broadcast %cst_34 : f32 to vector<16x1xf32>
    %111 = arith.divf %109, %110 : vector<16x1xf32>
    %112 = vector.broadcast %104 : vector<16x1xf32> to vector<16x32xf32>
    %113 = arith.subf %100, %112 : vector<16x32xf32>
    %cst_35 = arith.constant 9.99999974E-6 : f32
    %114 = vector.broadcast %cst_35 : f32 to vector<16x1xf32>
    %115 = arith.addf %111, %114 : vector<16x1xf32>
    %116 = math.rsqrt %115 : vector<16x1xf32>
    %117 = vector.broadcast %116 : vector<16x1xf32> to vector<16x32xf32>
    %118 = arith.mulf %113, %117 : vector<16x32xf32>
    %119 = vector.broadcast %7 : vector<1x32xf32> to vector<16x32xf32>
    %120 = arith.mulf %118, %119 : vector<16x32xf32>
    %121 = vector.broadcast %8 : vector<1x32xf32> to vector<16x32xf32>
    %122 = arith.addf %120, %121 : vector<16x32xf32>
    %123 = arith.truncf %122 : vector<16x32xf32> to vector<16x32xbf16>
    %cst_36 = arith.constant dense<0.000000e+00> : vector<16x64xf32>
    %124 = tpu.matmul %123, %14, %cst_36 {dimension_numbers = #tpu.dot_dimension_numbers<[1], [0], [0], [1], [0, 0, 1, 1], [], []>} : vector<16x32xbf16>, vector<32x64xbf16>, vector<16x64xf32> -> vector<16x64xf32>
    %125 = vector.broadcast %4 : vector<1x64xf32> to vector<16x64xf32>
    %126 = arith.addf %124, %125 : vector<16x64xf32>
    %cst_37 = arith.constant 0.000000e+00 : f32
    %127 = vector.broadcast %cst_37 : f32 to vector<16x64xf32>
    %128 = arith.maximumf %126, %127 : vector<16x64xf32>
    %129 = arith.truncf %128 : vector<16x64xf32> to vector<16x64xbf16>
    %c0_38 = arith.constant 0 : index
    %c0_39 = arith.constant 0 : index
    %130 = vector.load %arg3[%c0_38, %c0_39] : memref<64x32xbf16, #tpu.memory_space<vmem>>, vector<64x32xbf16>
    %cst_40 = arith.constant dense<0.000000e+00> : vector<16x32xf32>
    %131 = tpu.matmul %129, %130, %cst_40 {dimension_numbers = #tpu.dot_dimension_numbers<[1], [0], [0], [1], [0, 0, 1, 1], [], []>} : vector<16x64xbf16>, vector<64x32xbf16>, vector<16x32xf32> -> vector<16x32xf32>
    %132 = vector.broadcast %6 : vector<1x32xf32> to vector<16x32xf32>
    %133 = arith.addf %131, %132 : vector<16x32xf32>
    %134 = arith.addf %122, %133 : vector<16x32xf32>
    %cst_41 = arith.constant dense<0.000000e+00> : vector<16xf32>
    %135 = vector.multi_reduction <add>, %134, %cst_41 [1] : vector<16x32xf32> to vector<16xf32>
    %136 = vector.shape_cast %135 : vector<16xf32> to vector<16x1xf32>
    %cst_42 = arith.constant 3.200000e+01 : f32
    %137 = vector.broadcast %cst_42 : f32 to vector<16x1xf32>
    %138 = arith.divf %136, %137 : vector<16x1xf32>
    %139 = vector.broadcast %138 : vector<16x1xf32> to vector<16x32xf32>
    %140 = arith.subf %134, %139 : vector<16x32xf32>
    %141 = arith.mulf %140, %140 : vector<16x32xf32>
    %cst_43 = arith.constant dense<0.000000e+00> : vector<16xf32>
    %142 = vector.multi_reduction <add>, %141, %cst_43 [1] : vector<16x32xf32> to vector<16xf32>
    %143 = vector.shape_cast %142 : vector<16xf32> to vector<16x1xf32>
    %cst_44 = arith.constant 3.200000e+01 : f32
    %144 = vector.broadcast %cst_44 : f32 to vector<16x1xf32>
    %145 = arith.divf %143, %144 : vector<16x1xf32>
    %146 = vector.broadcast %138 : vector<16x1xf32> to vector<16x32xf32>
    %147 = arith.subf %134, %146 : vector<16x32xf32>
    %cst_45 = arith.constant 9.99999974E-6 : f32
    %148 = vector.broadcast %cst_45 : f32 to vector<16x1xf32>
    %149 = arith.addf %145, %148 : vector<16x1xf32>
    %150 = math.rsqrt %149 : vector<16x1xf32>
    %151 = vector.broadcast %150 : vector<16x1xf32> to vector<16x32xf32>
    %152 = arith.mulf %147, %151 : vector<16x32xf32>
    %153 = vector.broadcast %9 : vector<1x32xf32> to vector<16x32xf32>
    %154 = arith.mulf %152, %153 : vector<16x32xf32>
    %155 = vector.broadcast %10 : vector<1x32xf32> to vector<16x32xf32>
    %156 = arith.addf %154, %155 : vector<16x32xf32>
    %c0_46 = arith.constant 0 : index
    %c0_47 = arith.constant 0 : index
    %157 = vector.load %arg5[%c0_46, %c0_47] : memref<16x32xf32, #tpu.memory_space<vmem>>, vector<16x32xf32>
    tpu.vector_store %arg5[%c0_46, %c0_47], %156 {strides = array<i32>} : memref<16x32xf32, #tpu.memory_space<vmem>>, vector<16x32xf32>,
    return
  }
}

</mosaic_0001>

<bundles_post_ra>
// kernel: _transformer_layer_impl.1
= control target key start
LH: loop header
LB: loop body
LE: loop exit
PB: predicated region body
PF: predicated region fallthrough
CT: control target
= control target key end

     0   :  { %v1138_v1 = vmov 0.0   ;;  %vm1139_vm0 = vmmov 0   ;;  %vm48_vm1 = vcmask 261120   ;;  %s1384_s0 = inlined_call_operand.vmem [shape: f32[16,32], index: 0, kind: input, shape index: {}]   ;;  %s1385_s1 = inlined_call_operand.vmem [shape: f32[16,16], index: 1, kind: input, shape index: {}]   ;;  %s1386_s2 = inlined_call_operand.vmem [shape: bf16[32,192], index: 2, kind: input, shape index: {}]   ;;  %s1387_s3 = inlined_call_operand.vmem [shape: bf16[64,32], index: 3, kind: input, shape index: {}]   ;;  %s1388_s4 = inlined_call_operand.vmem [shape: f32[8,128], index: 4, kind: input, shape index: {}]   ;;  %s1389_s5 = inlined_call_operand.hbm [shape: f32[16,32], index: 5, kind: output, shape index: {}]  }
   0x1   :  { %v1190_v0 = vld [vmem:[%s1386_s2] ss:$8 sps:$4 sm:$0xff]   ;;  %961 = vmatprep.subr.bf16.mxu0 %v1138_v1  ;;  %965 = vmatprep.mubr.msk.bf16.mxu0 %vm1139_vm0, %v1138_v1  ;;  %v1199_v2 = vld [vmem:[%s1386_s2 + $0x10] ss:$8 sps:$4 sm:$0xff]  }
   0x2   :  { %962 = vmatpush3.bf16.msra.mxu0 %v1190_v0  ;;  %v1204_v3 = vld [vmem:[%s1384_s0] sm:$0xff]  ;;  %969 = vmatprep.subr.bf16.mxu1 %v1138_v1  ;;  %v1211_v4 = vld [vmem:[%s1384_s0 + $0x8] sm:$0xff] }
   0x3   :  { %963 = vmatprep.subr.bf16.mxu0 %v1138_v1  ;;  %971 = vmatprep.mubr.msk.bf16.mxu1 %vm1139_vm0, %v1138_v1  ;;  %v31_v5 = vpack.c.bf16 %v1211_v4, %v1204_v3 }
   0x6   :  { %964 = vmatpush3.bf16.msra.mxu0 %v1199_v2 }
   0x7   :  { %10 = vsyncpa [#allocation4], 0  ;;  %975 = vmatprep.subr.bf16.mxu0 %v1138_v1  ;;  %v32_v6 = vlaneseq  ;;  %v1228_v9 = vld [vmem:[%s1388_s4] sm:$0xff]  ;;  %s1140_s27 = smov 120   ;;  %s1141_s28 = smov 96   ;;  %vm97_vm2 = vcmask 64512  }
   0x8   :  { %s1142_s29 = smov 80   ;;  %s1143_s4 = smov 88   ;;  %v24_v29 = vld [vmem:[%s1385_s1] sm:$0xff]  ;;  %v25_v31 = vld [vmem:[%s1385_s1 + $0x8] sm:$0xff]  ;;  %vm145_vm3 = vcmask 130048   ;;  %vm347_vm4 = vcmask 130112  }
   0x9   :  { %966 = vmatmul.mubr.msk.bf16.vlgmr.msra.gmra.mrb[0].mxu0 %vm48_vm1, %v31_v5  ;;  %v1222_v7 = vshrl.u32 %v32_v6, 7  ;;  %s1144_s30 = smov 72   ;;  %s1145_s6 = smov 112   ;;  %vm479_vm5 = vcmask 195712   ;;  %vm611_vm6 = vcmask 261312   ;;  %vm808_vm7 = vcmask 523264  }
   0xa   :  { %977 = vmatprep.mubr.msk.bf16.mxu0 %vm1139_vm0, %v1138_v1  ;;  %s1146_s7 = smov 104   ;;  %s1147_s1 = smov 56  }
   0xb   :  { %v34_v8 = vsub.s32 0, %v1222_v7  ;;  %s1148_s12 = smov 64   ;;  %s1149_s13 = smov 48  }
   0xc   :  { %s1150_s14 = smov 40   ;;  %s1151_s19 = smov 8  }
   0xd   :  { %v35_v10 = vrot.slane %v1228_v9, %v34_v8  ;;  %s1153_s20 = smov 24   ;;  %s1154_s21 = smov 32  }
  0xdc   :  { %v86_v11 = vpop.f32.mrb[0].mxu0 }
  0xdd   :  { %v967_v12 = vpop.f32.mrb[1].mxu0  ;;  %v87_v14 = vadd.f32 %v86_v11, %v35_v10 }
  0xde   :  { %v89_v13 = vpop.f32.mrb[2].mxu0 }
  0xdf   :  { %v90_v15 = vadd.f32 %v89_v13, %v35_v10  ;;  %v968_v16 = vpop.f32.mrb[3].mxu0 }
  0xe1   :  { %v1231_v17 = vpack.c.bf16 %v90_v15, %v87_v14 }
  0xe3   :  { %218 = vrot.lane.b32.xlu1 %v1231_v17, %s1140_s27  ;;  %95 = vrot.lane.b32.xlu0 %v1231_v17, %s1141_s28 }
  0xe7   :  { %352 = vrot.lane.b32.xlu1 %v1231_v17, %s1142_s29  ;;  %220 = vrot.lane.b32.xlu0 %v1231_v17, %s1143_s4 }
  0xeb   :  { %484 = vrot.lane.b32.xlu1 %v1231_v17, %s1144_s30  ;;  %350 = vrot.lane.b32.xlu0 %v1231_v17, %s1145_s6 }
  0xef   :  { %482 = vrot.lane.b32.xlu0 %v1231_v17, %s1146_s7 }
 0x155   :  { %v96_v18 = vpop.permute.xlu0 %95  ;;  %v219_v21 = vpop.permute.xlu1 %218 }
 0x156   :  { %v102_v19 = vsel %vm97_vm2, %v96_v18, 0 }
 0x157   :  { %970 = vmatpush3.bf16.xpose.msra.mxu1 %v102_v19 }
 0x158   :  { %981 = vmatprep.subr.bf16.mxu1 %v1138_v1 }
 0x159   :  { %v221_v20 = vpop.permute.xlu0 %220  ;;  %v353_v23 = vpop.permute.xlu1 %352 }
 0x15a   :  { %v226_v22 = vsel %vm97_vm2, %v221_v20, 0  ;;  %v358_v24 = vsel %vm97_vm2, %v353_v23, 0 }
 0x15d   :  { %v485_v25 = vpop.permute.xlu1 %484  ;;  %v351_v26 = vpop.permute.xlu0 %350 }
 0x15e   :  { %972 = vmatmul.mubr.msk.bf16.vlgmr.msra.gmra.mrb[0].mxu1 %vm97_vm2, %v1231_v17  ;;  %v490_v27 = vsel %vm97_vm2, %v485_v25, 0 }
 0x15f   :  { %982 = vmatpush3.bf16.xpose.msra.mxu1 %v226_v22  ;;  %983 = vmatprep.mubr.msk.bf16.mxu1 %vm1139_vm0, %v1138_v1 }
 0x160   :  { %993 = vmatprep.subr.bf16.mxu1 %v1138_v1 }
 0x161   :  { %v483_v28 = vpop.permute.xlu0 %482 }
 0x166   :  { %984 = vmatmul.mubr.msk.bf16.vlgmr.msra.gmra.mrb[4].mxu1 %vm97_vm2, %v219_v21 }
 0x167   :  { %994 = vmatpush3.bf16.xpose.msra.mxu1 %v358_v24  ;;  %995 = vmatprep.mubr.msk.bf16.mxu1 %vm1139_vm0, %v1138_v1 }
 0x168   :  { %1005 = vmatprep.subr.bf16.mxu1 %v1138_v1 }
 0x16e   :  { %996 = vmatmul.mubr.msk.bf16.vlgmr.msra.gmra.mrb[8].mxu1 %vm97_vm2, %v351_v26 }
 0x16f   :  { %1006 = vmatpush3.bf16.xpose.msra.mxu1 %v490_v27  ;;  %1007 = vmatprep.mubr.msk.bf16.mxu1 %vm1139_vm0, %v1138_v1 }
 0x170   :  { %1017 = vmatprep.subr.bf16.mxu1 %v1138_v1 }
 0x176   :  { %1008 = vmatmul.mubr.msk.bf16.vlgmr.msra.gmra.mrb[12].mxu1 %vm97_vm2, %v483_v28 }
 0x177   :  { %1021 = vmatprep.mubr.msk.bf16.mxu1 %vm1139_vm0, %v1138_v1 }
 0x231   :  { %v138_v30 = vpop.f32.mrb[0].mxu1 }
 0x232   :  { %v139_v32 = vadd.f32 %v138_v30, %v24_v29  ;;  %v973_v33 = vpop.f32.mrb[1].mxu1 }
 0x233   :  { %v141_v34 = vpop.f32.mrb[2].mxu1 }
 0x234   :  { %v142_v35 = vadd.f32 %v141_v34, %v25_v31  ;;  %v974_v36 = vpop.f32.mrb[3].mxu1  ;;  %v146_v37 = vsel %vm145_vm3, %v139_v32, -inf }
 0x235   :  { %147 = vmax.xlane.f32.xlu1 %v146_v37 }
 0x236   :  { %v149_v38 = vsel %vm145_vm3, %v142_v35, -inf }
 0x237   :  { %150 = vmax.xlane.f32.xlu0 %v149_v38 }
 0x239   :  { %v262_v39 = vpop.f32.mrb[4].mxu1 }
 0x23a   :  { %v263_v40 = vadd.f32 %v262_v39, %v24_v29  ;;  %v985_v41 = vpop.f32.mrb[5].mxu1 }
 0x23b   :  { %v265_v42 = vpop.f32.mrb[6].mxu1 }
 0x23c   :  { %v266_v43 = vadd.f32 %v265_v42, %v25_v31  ;;  %v986_v44 = vpop.f32.mrb[7].mxu1  ;;  %v269_v45 = vsel %vm145_vm3, %v263_v40, -inf }
 0x23d   :  { %270 = vmax.xlane.f32.xlu0 %v269_v45 }
 0x23e   :  { %v272_v46 = vsel %vm145_vm3, %v266_v43, -inf }
 0x23f   :  { %273 = vmax.xlane.f32.xlu1 %v272_v46 }
 0x241   :  { %v394_v47 = vpop.f32.mrb[8].mxu1 }
 0x242   :  { %v395_v48 = vadd.f32 %v394_v47, %v24_v29  ;;  %v997_v49 = vpop.f32.mrb[9].mxu1 }
 0x243   :  { %v397_v50 = vpop.f32.mrb[10].mxu1 }
 0x244   :  { %v398_v51 = vadd.f32 %v397_v50, %v25_v31  ;;  %v998_v52 = vpop.f32.mrb[11].mxu1  ;;  %v401_v53 = vsel %vm145_vm3, %v395_v48, -inf }
 0x245   :  { %402 = vmax.xlane.f32.xlu0 %v401_v53 }
 0x246   :  { %v404_v54 = vsel %vm145_vm3, %v398_v51, -inf }
 0x247   :  { %405 = vmax.xlane.f32.xlu1 %v404_v54 }
 0x249   :  { %v526_v55 = vpop.f32.mrb[12].mxu1 }
 0x24a   :  { %v527_v56 = vadd.f32 %v526_v55, %v24_v29  ;;  %v1009_v57 = vpop.f32.mrb[13].mxu1 }
 0x24b   :  { %v529_v58 = vpop.f32.mrb[14].mxu1 }
 0x24c   :  { %v530_v59 = vadd.f32 %v529_v58, %v25_v31  ;;  %v1010_v60 = vpop.f32.mrb[15].mxu1  ;;  %v533_v61 = vsel %vm145_vm3, %v527_v56, -inf }
 0x24d   :  { %534 = vmax.xlane.f32.xlu0 %v533_v61 }
 0x24e   :  { %v536_v62 = vsel %vm145_vm3, %v530_v59, -inf }
 0x24f   :  { %537 = vmax.xlane.f32.xlu1 %v536_v62 }
 0x2c2   :  { %v148_v63 = vpop.xlane.xlu1 %147 }
 0x2c3   :  { %v152_v5 = vsub.f32 %v139_v32, %v148_v63 }
 0x2c4   :  { %v151_v6 = vpop.xlane.xlu0 %150 }
 0x2c5   :  { %v154_v8 = vmul.f32 1.442695, %v152_v5  ;;  %v153_v10 = vsub.f32 %v142_v35, %v151_v6 }
 0x2c7   :  { %1074 = vpow2.f32 %v154_v8  ;;  %v156_v11 = vmul.f32 1.442695, %v153_v10 }
 0x2c9   :  { %1076 = vpow2.f32 %v156_v11 }
 0x2ca   :  { %v271_v12 = vpop.xlane.xlu0 %270 }
 0x2cb   :  { %v275_v13 = vsub.f32 %v263_v40, %v271_v12 }
 0x2cc   :  { %v274_v22 = vpop.xlane.xlu1 %273 }
 0x2cd   :  { %v277_v14 = vmul.f32 1.442695, %v275_v13  ;;  %v276_v23 = vsub.f32 %v266_v43, %v274_v22 }
 0x2cf   :  { %1078 = vpow2.f32 %v277_v14  ;;  %v279_v26 = vmul.f32 1.442695, %v276_v23  ;;  %v1069_v23 = vld [vmem:[%s1386_s2 + $0x14] ss:$8 sps:$4 sm:$0xff]  }
 0x2d1   :  { %v1075_v15 = vpop.eup %1074  ;;  %1080 = vpow2.f32 %v279_v26 }
 0x2d2   :  { %v158_v16 = vsel %vm145_vm3, %v1075_v15, 0.0  ;;  %v403_v25 = vpop.xlane.xlu0 %402 }
 0x2d3   :  { %v1077_v18 = vpop.eup %1076  ;;  %159 = vadd.xlane.f32.xlu0 %v158_v16  ;;  %v407_v29 = vsub.f32 %v395_v48, %v403_v25 }
 0x2d4   :  { %v161_v19 = vsel %vm145_vm3, %v1077_v18, 0.0  ;;  %v406_v24 = vpop.xlane.xlu1 %405 }
 0x2d5   :  { %162 = vadd.xlane.f32.xlu1 %v161_v19  ;;  %v408_v27 = vsub.f32 %v398_v51, %v406_v24  ;;  %v409_v33 = vmul.f32 1.442695, %v407_v29 }
 0x2d7   :  { %v411_v31 = vmul.f32 1.442695, %v408_v27 }
 0x2d9   :  { %v1277_v20 = vpop.eup %1078  ;;  %1082 = vpow2.f32 %v411_v31 }
 0x2da   :  { %v281_v21 = vsel %vm145_vm3, %v1277_v20, 0.0  ;;  %v535_v30 = vpop.xlane.xlu0 %534  ;;  %1084 = vpow2.f32 %v409_v33 }
 0x2db   :  { %282 = vadd.xlane.f32.xlu0 %v281_v21  ;;  %v539_v34 = vsub.f32 %v527_v56, %v535_v30  ;;  %v1081_v37 = vpop.eup %1080  ;;  %v1066_v21 = vld [vmem:[%s1386_s2 + $0x4] ss:$8 sps:$4 sm:$0xff]   ;;  %s1152_s2 = smov 16  }
 0x2dc   :  { %v538_v28 = vpop.xlane.xlu1 %537  ;;  %v284_v38 = vsel %vm145_vm3, %v1081_v37, 0.0 }
 0x2dd   :  { %v540_v32 = vsub.f32 %v530_v59, %v538_v28  ;;  %v541_v36 = vmul.f32 1.442695, %v539_v34 }
 0x2df   :  { %v543_v35 = vmul.f32 1.442695, %v540_v32 }
 0x2e1   :  { %1086 = vpow2.f32 %v543_v35 }
 0x2e2   :  { %1088 = vpow2.f32 %v541_v36 }
 0x2e3   :  { %v1083_v39 = vpop.eup %1082 }
 0x2e4   :  { %v1085_v40 = vpop.eup %1084  ;;  %v416_v41 = vsel %vm145_vm3, %v1083_v39, 0.0 }
 0x2e5   :  { %v413_v43 = vsel %vm145_vm3, %v1085_v40, 0.0 }
 0x2e6   :  { %292 = vrot.lane.b32.xlu1 %v1231_v17, %s1147_s1 }
 0x2eb   :  { %v1285_v42 = vpop.eup %1086 }
 0x2ec   :  { %v1089_v44 = vpop.eup %1088  ;;  %v548_v45 = vsel %vm145_vm3, %v1285_v42, 0.0 }
 0x2ed   :  { %v545_v46 = vsel %vm145_vm3, %v1089_v44, 0.0 }
 0x2f1   :  { %169 = vrot.lane.b32.xlu0 %v1231_v17, %s1148_s12 }
 0x30a   :  { %285 = vadd.xlane.f32.xlu1 %v284_v38 }
 0x30e   :  { %417 = vadd.xlane.f32.xlu1 %v416_v41 }
 0x310   :  { %414 = vadd.xlane.f32.xlu0 %v413_v43 }
 0x312   :  { %549 = vadd.xlane.f32.xlu1 %v548_v45 }
 0x314   :  { %546 = vadd.xlane.f32.xlu0 %v545_v46 }
 0x323   :  { %424 = vrot.lane.b32.xlu1 %v1231_v17, %s1149_s13 }
 0x32a   :  { %556 = vrot.lane.b32.xlu0 %v1231_v17, %s1150_s14 }
 0x360   :  { %v160_v47 = vpop.xlane.xlu0 %159 }
 0x361   :  { %1090 = vrcp.f32 %v160_v47 }
 0x362   :  { %v163_v48 = vpop.xlane.xlu1 %162 }
 0x363   :  { %1092 = vrcp.f32 %v163_v48 }
 0x366   :  { %v293_v56 = vpop.permute.xlu1 %292 }
 0x368   :  { %v283_v49 = vpop.xlane.xlu0 %282 }
 0x369   :  { %1094 = vrcp.f32 %v283_v49  ;;  %v619_v49 = vsub.s32 2, %v1222_v7 }
 0x36b   :  { %v1091_v50 = vpop.eup %1090 }
 0x36c   :  { %v170_v51 = vpop.permute.xlu0 %169  ;;  %v166_v53 = vmul.f32 %v1091_v50, %v1075_v15  ;;  %v620_v50 = vrot.slane %v1228_v9, %v619_v49 }
 0x36d   :  { %v1093_v52 = vpop.eup %1092  ;;  %976 = vmatpush3.bf16.msra.mxu0 %v170_v51 }
 0x36e   :  { %v167_v54 = vmul.f32 %v1093_v52, %v1077_v18  ;;  %987 = vmatprep.subr.bf16.mxu0 %v1138_v1 }
 0x370   :  { %v168_v55 = vpack.c.bf16 %v167_v54, %v166_v53 }
 0x372   :  { %978 = vmatmul.mubr.msk.bf16.vlgmr.msra.gmra.mrb[4].mxu0 %vm145_vm3, %v168_v55 }
 0x373   :  { %988 = vmatpush3.bf16.msra.mxu0 %v293_v56  ;;  %989 = vmatprep.mubr.msk.bf16.mxu0 %vm1139_vm0, %v1138_v1  ;;  %v1095_v59 = vpop.eup %1094 }
 0x374   :  { %999 = vmatprep.subr.bf16.mxu0 %v1138_v1  ;;  %v289_v63 = vmul.f32 %v1095_v59, %v1277_v20 }
 0x397   :  { %v286_v17 = vpop.xlane.xlu1 %285 }
 0x398   :  { %1096 = vrcp.f32 %v286_v17 }
 0x39b   :  { %v418_v57 = vpop.xlane.xlu1 %417 }
 0x39c   :  { %1098 = vrcp.f32 %v418_v57 }
 0x39d   :  { %v415_v58 = vpop.xlane.xlu0 %414 }
 0x39e   :  { %1100 = vrcp.f32 %v415_v58 }
 0x39f   :  { %v550_v60 = vpop.xlane.xlu1 %549 }
 0x3a1   :  { %v547_v61 = vpop.xlane.xlu0 %546 }
 0x3a2   :  { %v1097_v62 = vpop.eup %1096  ;;  %1102 = vrcp.f32 %v547_v61 }
 0x3a3   :  { %v290_v5 = vmul.f32 %v1097_v62, %v1081_v37  ;;  %1104 = vrcp.f32 %v550_v60  ;;  %v425_v10 = vpop.permute.xlu1 %424 }
 0x3a5   :  { %v291_v6 = vpack.c.bf16 %v290_v5, %v289_v63  ;;  %v557_v16 = vpop.permute.xlu0 %556 }
 0x3a6   :  { %v1099_v8 = vpop.eup %1098 }
 0x3a7   :  { %990 = vmatmul.mubr.msk.bf16.vlgmr.msra.gmra.mrb[8].mxu0 %vm145_vm3, %v291_v6  ;;  %v422_v13 = vmul.f32 %v1099_v8, %v1083_v39 }
 0x3a8   :  { %v1101_v11 = vpop.eup %1100  ;;  %1000 = vmatpush3.bf16.msra.mxu0 %v425_v10  ;;  %1001 = vmatprep.mubr.msk.bf16.mxu0 %vm1139_vm0, %v1138_v1 }
 0x3a9   :  { %v421_v12 = vmul.f32 %v1101_v11, %v1085_v40  ;;  %1011 = vmatprep.subr.bf16.mxu0 %v1138_v1 }
 0x3ab   :  { %v423_v14 = vpack.c.bf16 %v422_v13, %v421_v12  ;;  %v1071_v12 = vld [vmem:[%s1387_s3 + $0x8] sm:$0xff]  }
 0x3ac   :  { %v1103_v15 = vpop.eup %1102 }
 0x3ad   :  { %v1105_v18 = vpop.eup %1104  ;;  %v553_v19 = vmul.f32 %v1103_v15, %v1089_v44 }
 0x3ae   :  { %v554_v20 = vmul.f32 %v1105_v18, %v1285_v42 }
 0x3af   :  { %1002 = vmatmul.mubr.msk.bf16.vlgmr.msra.gmra.mrb[12].mxu0 %vm145_vm3, %v423_v14 }
 0x3b0   :  { %1012 = vmatpush3.bf16.msra.mxu0 %v557_v16  ;;  %1013 = vmatprep.mubr.msk.bf16.mxu0 %vm1139_vm0, %v1138_v1  ;;  %v555_v22 = vpack.c.bf16 %v554_v20, %v553_v19  ;;  %v702_v20 = vsub.s32 4, %v1222_v7 }
 0x3b1   :  { %1025 = vmatprep.subr.bf16.mxu0 %v1138_v1 }
 0x3b7   :  { %1014 = vmatmul.mubr.msk.bf16.vlgmr.msra.gmra.mrb[16].mxu0 %vm145_vm3, %v555_v22  ;;  %v708_v22 = vsub.s32 5, %v1222_v7 }
 0x3b8   :  { %1026 = vmatpush3.bf16.msra.mxu0 %v1066_v21  ;;  %1029 = vmatprep.mubr.msk.bf16.mxu0 %vm1139_vm0, %v1138_v1  ;;  %v703_v21 = vrot.slane %v1228_v9, %v702_v20 }
 0x3b9   :  { %1027 = vmatprep.subr.bf16.mxu0 %v1138_v1 }
 0x3bc   :  { %1028 = vmatpush3.bf16.msra.mxu0 %v1069_v23 }
 0x445   :  { %v209_v24 = vpop.f32.mrb[4].mxu0 }
 0x446   :  { %216 = vst.msk [vmem:[#allocation2] sm:$0xff] %vm97_vm2, %v209_v24  ;;  %v979_v25 = vpop.f32.mrb[5].mxu0 }
 0x447   :  { %v212_v26 = vpop.f32.mrb[6].mxu0 }
 0x448   :  { %217 = vst.msk [vmem:[#allocation2 + $0x8] sm:$0xff] %vm97_vm2, %v212_v26  ;;  %v980_v27 = vpop.f32.mrb[7].mxu0 }
 0x47a   :  { %v332_v28 = vpop.f32.mrb[8].mxu0 }
 0x47b   :  { %341 = vrot.lane.b32.xlu1 %v332_v28, %s1151_s19  ;;  %v991_v29 = vpop.f32.mrb[9].mxu0  ;;  %v709_v28 = vrot.slane %v1228_v9, %v708_v22 }
 0x47c   :  { %v335_v30 = vpop.f32.mrb[10].mxu0 }
 0x47d   :  { %343 = vrot.lane.b32.xlu0 %v335_v30, %s1151_s19  ;;  %v992_v31 = vpop.f32.mrb[11].mxu0 }
 0x482   :  { %v464_v32 = vpop.f32.mrb[12].mxu0 }
 0x483   :  { %473 = vrot.lane.b32.xlu1 %v464_v32, %s1152_s2  ;;  %v1003_v33 = vpop.f32.mrb[13].mxu0 }
 0x484   :  { %v467_v34 = vpop.f32.mrb[14].mxu0  ;;  %v1072_v33 = vld [vmem:[%s1387_s3 + $0x10] sm:$0xff]  }
 0x485   :  { %475 = vrot.lane.b32.xlu0 %v467_v34, %s1152_s2  ;;  %v1004_v35 = vpop.f32.mrb[15].mxu0  ;;  %v1073_v34 = vld [vmem:[%s1387_s3 + $0x18] sm:$0xff]  }
 0x486   :  { %v715_v35 = vsub.s32 1, %v1222_v7 }
 0x48a   :  { %v596_v36 = vpop.f32.mrb[16].mxu0 }
 0x48b   :  { %605 = vrot.lane.b32.xlu1 %v596_v36, %s1153_s20  ;;  %v1015_v37 = vpop.f32.mrb[17].mxu0  ;;  %v716_v36 = vrot.slane %v1228_v9, %v715_v35 }
 0x48c   :  { %v599_v38 = vpop.f32.mrb[18].mxu0 }
 0x48d   :  { %607 = vrot.lane.b32.xlu0 %v599_v38, %s1153_s20  ;;  %v1016_v39 = vpop.f32.mrb[19].mxu0 }
 0x48f   :  { %621 = vrot.lane.b32.xlu1 %v1190_v0, %s1154_s21 }
 0x491   :  { %623 = vrot.lane.b32.xlu0 %v1199_v2, %s1154_s21 }
 0x4ed   :  { %v342_v40 = vpop.permute.xlu1 %341 }
 0x4ee   :  { %348 = vst.msk [vmem:[#allocation2] sm:$0xff] %vm347_vm4, %v342_v40 }
 0x4ef   :  { %v344_v41 = vpop.permute.xlu0 %343 }
 0x4f0   :  { %349 = vst.msk [vmem:[#allocation2 + $0x8] sm:$0xff] %vm347_vm4, %v344_v41 }
 0x4f5   :  { %v474_v42 = vpop.permute.xlu1 %473 }
 0x4f6   :  { %480 = vst.msk [vmem:[#allocation2] sm:$0xff] %vm479_vm5, %v474_v42 }
 0x4f7   :  { %v476_v43 = vpop.permute.xlu0 %475 }
 0x4f8   :  { %481 = vst.msk [vmem:[#allocation2 + $0x8] sm:$0xff] %vm479_vm5, %v476_v43 }
 0x4fd   :  { %v606_v44 = vpop.permute.xlu1 %605 }
 0x4fe   :  { %612 = vst.msk [vmem:[#allocation2] sm:$0xff] %vm611_vm6, %v606_v44 }
 0x4ff   :  { %v608_v45 = vpop.permute.xlu0 %607 }
 0x500   :  { %613 = vst.msk [vmem:[#allocation2 + $0x8] sm:$0xff] %vm611_vm6, %v608_v45 }
 0x501   :  { %v622_v46 = vpop.permute.xlu1 %621 }
 0x502   :  { %1018 = vmatpush3.bf16.msra.mxu1 %v622_v46 }
 0x503   :  { %1019 = vmatprep.subr.bf16.mxu1 %v1138_v1  ;;  %v624_v0 = vpop.permute.xlu0 %623 }
 0x505   :  { %v614_v2 = vld [vmem:[#allocation2] sm:$0xff] }
 0x506   :  { %1020 = vmatpush3.bf16.msra.mxu1 %v624_v0 }
 0x507   :  { %v615_v47 = vld [vmem:[#allocation2 + $0x8] sm:$0xff]  ;;  %1033 = vmatprep.subr.bf16.mxu1 %v1138_v1 }
 0x508   :  { %v616_v48 = vpack.c.bf16 %v615_v47, %v614_v2 }
 0x50a   :  { %1022 = vmatmul.mubr.msk.bf16.vlgmr.msra.gmra.mrb[16].mxu1 %vm48_vm1, %v616_v48 }
 0x50b   :  { %1041 = vmatprep.mubr.msk.bf16.mxu1 %vm1139_vm0, %v1138_v1 }
 0x5dd   :  { %v664_v51 = vpop.f32.mrb[16].mxu1 }
 0x5de   :  { %v665_v52 = vadd.f32 %v664_v51, %v620_v50  ;;  %v1023_v53 = vpop.f32.mrb[17].mxu1 }
 0x5df   :  { %v667_v54 = vpop.f32.mrb[18].mxu1 }
 0x5e0   :  { %v668_v55 = vadd.f32 %v667_v54, %v620_v50  ;;  %v1024_v56 = vpop.f32.mrb[19].mxu1  ;;  %v671_v17 = vadd.f32 %v665_v52, %v1204_v3 }
 0x5e2   :  { %v673_v57 = vsel %vm48_vm1, %v671_v17, 0.0  ;;  %v672_v58 = vadd.f32 %v668_v55, %v1211_v4  ;;  %v1070_v4 = vld [vmem:[%s1387_s3] sm:$0xff]   ;;  %s1155_s3 = smov [#allocation3]  }
 0x5e3   :  { %674 = vadd.xlane.f32.xlu1 %v673_v57  ;;  %1034 = vmatpush3.bf16.msra.mxu1 %v1070_v4  ;;  %v883_v4 = vsub.s32 6, %v1222_v7  ;;  %s900_s29 = sshll.u32 %s1155_s3, 4  ;;  %s901_s29 = int_to_ptr.vmem [resolvable:$true] %s900_s29 }
 0x5e4   :  { %v676_v59 = vsel %vm48_vm1, %v672_v58, 0.0  ;;  %1035 = vmatprep.subr.bf16.mxu1 %v1138_v1  ;;  %s1114_s4 = scalar_lea.vmem %s901_s29, 256  ;;  %p1119_p1 = scmp.lt.s32.totalorder %s901_s29, %s901_s29 }
 0x5e5   :  { %677 = vadd.xlane.f32.xlu0 %v676_v59  ;;  %p1115_p0 = scmp.ne.s32.totalorder %s901_s29, %s1114_s4  ;;  %p1120_p2 = scmp.lt.s32.totalorder %s1114_s4, %s1114_s4 }
 0x5e7   :  { %1036 = vmatpush3.bf16.msra.mxu1 %v1071_v12  ;;  %v889_v12 = vsub.s32 7, %v1222_v7  ;;  %p1121_p3 = por %p1120_p2, %p1119_p1 }
 0x5e8   :  { %1037 = vmatprep.subr.bf16.mxu1 %v1138_v1 }
 0x5e9   :  { %p1122_p4 = pnand %p1121_p3, %p1115_p0 }
 0x5eb   :  { %1038 = vmatpush3.bf16.msra.mxu1 %v1072_v33 }
 0x5ec   :  { %1039 = vmatprep.subr.bf16.mxu1 %v1138_v1  ;;  %v782_v1 = vsub.s32 3, %v1222_v7 }
 0x5ee   :  { %v783_v46 = vrot.slane %v1228_v9, %v782_v1 }
 0x5ef   :  { %1040 = vmatpush3.bf16.msra.mxu1 %v1073_v34 }
 0x670   :  { %v675_v60 = vpop.xlane.xlu1 %674 }
 0x671   :  { %v680_v61 = vmul.f32 0.03125, %v675_v60 }
 0x672   :  { %v678_v62 = vpop.xlane.xlu0 %677 }
 0x673   :  { %v682_v63 = vsub.f32 %v671_v17, %v680_v61  ;;  %v681_v5 = vmul.f32 0.03125, %v678_v62 }
 0x675   :  { %v683_v6 = vsub.f32 %v672_v58, %v681_v5  ;;  %v684_v8 = vmul.f32 %v682_v63, %v682_v63 }
 0x677   :  { %v686_v10 = vsel %vm48_vm1, %v684_v8, 0.0  ;;  %v685_v11 = vmul.f32 %v683_v6, %v683_v6 }
 0x678   :  { %687 = vadd.xlane.f32.xlu0 %v686_v10 }
 0x679   :  { %v689_v3 = vsel %vm48_vm1, %v685_v11, 0.0 }
 0x67a   :  { %690 = vadd.xlane.f32.xlu1 %v689_v3 }
 0x705   :  { %v688_v13 = vpop.xlane.xlu0 %687 }
 0x706   :  { %v692_v14 = vmul.f32 0.03125, %v688_v13  ;;  %v884_v13 = vrot.slane %v1228_v9, %v883_v4 }
 0x707   :  { %v691_v15 = vpop.xlane.xlu1 %690 }
 0x708   :  { %v694_v16 = vadd.f32 1e-05, %v692_v14  ;;  %v693_v18 = vmul.f32 0.03125, %v691_v15 }
 0x70a   :  { %1106 = vrsqrt.f32 %v694_v16  ;;  %v695_v19 = vadd.f32 1e-05, %v693_v18  ;;  %v890_v16 = vrot.slane %v1228_v9, %v889_v12 }
 0x70c   :  { %1108 = vrsqrt.f32 %v695_v19 }
 0x714   :  { %v1107_v23 = vpop.eup %1106 }
 0x715   :  { %v698_v24 = vmul.f32 %v1107_v23, %v682_v63 }
 0x716   :  { %v1109_v25 = vpop.eup %1108 }
 0x717   :  { %v704_v26 = vmul.f32 %v703_v21, %v698_v24  ;;  %v699_v27 = vmul.f32 %v1109_v25, %v683_v6 }
 0x719   :  { %v705_v29 = vmul.f32 %v703_v21, %v699_v27  ;;  %v710_v30 = vadd.f32 %v709_v28, %v704_v26 }
 0x71b   :  { %v711_v31 = vadd.f32 %v709_v28, %v705_v29 }
 0x71d   :  { %v712_v32 = vpack.c.bf16 %v711_v31, %v710_v30 }
 0x71f   :  { %1030 = vmatmul.mubr.msk.bf16.vlgmr.msra.gmra.mrb[20].mxu0 %vm48_vm1, %v712_v32 }
 0x7f2   :  { %v762_v37 = vpop.f32.mrb[20].mxu0 }
 0x7f3   :  { %v763_v38 = vadd.f32 %v762_v37, %v716_v36  ;;  %v1031_v39 = vpop.f32.mrb[21].mxu0 }
 0x7f4   :  { %v765_v40 = vpop.f32.mrb[22].mxu0 }
 0x7f5   :  { %v766_v41 = vadd.f32 %v765_v40, %v716_v36  ;;  %v1032_v42 = vpop.f32.mrb[23].mxu0  ;;  %v769_v43 = vmax.f32 %v763_v38, 0.0 }
 0x7f7   :  { %v770_v44 = vmax.f32 %v766_v41, 0.0 }
 0x7f9   :  { %v771_v45 = vpack.c.bf16 %v770_v44, %v769_v43 }
 0x7fb   :  { %1042 = vmatmul.mubr.msk.bf16.vlgmr.msra.gmra.mrb[20].mxu1 %vm808_vm7, %v771_v45 }
 0x8ce   :  { %v846_v0 = vpop.f32.mrb[20].mxu1 }
 0x8cf   :  { %v847_v2 = vadd.f32 %v846_v0, %v783_v46  ;;  %v1043_v47 = vpop.f32.mrb[21].mxu1 }
 0x8d0   :  { %v849_v48 = vpop.f32.mrb[22].mxu1 }
 0x8d1   :  { %v850_v49 = vadd.f32 %v849_v48, %v783_v46  ;;  %v1044_v50 = vpop.f32.mrb[23].mxu1  ;;  %v853_v51 = vadd.f32 %v847_v2, %v710_v30 }
 0x8d3   :  { %v855_v52 = vsel %vm48_vm1, %v853_v51, 0.0  ;;  %v854_v53 = vadd.f32 %v850_v49, %v711_v31 }
 0x8d4   :  { %856 = vadd.xlane.f32.xlu0 %v855_v52 }
 0x8d5   :  { %v858_v54 = vsel %vm48_vm1, %v854_v53, 0.0 }
 0x8d6   :  { %859 = vadd.xlane.f32.xlu1 %v858_v54 }
 0x961   :  { %v857_v55 = vpop.xlane.xlu0 %856 }
 0x962   :  { %v861_v56 = vmul.f32 0.03125, %v857_v55 }
 0x963   :  { %v860_v17 = vpop.xlane.xlu1 %859 }
 0x964   :  { %v863_v57 = vsub.f32 %v853_v51, %v861_v56  ;;  %v862_v58 = vmul.f32 0.03125, %v860_v17 }
 0x966   :  { %v864_v59 = vsub.f32 %v854_v53, %v862_v58  ;;  %v865_v60 = vmul.f32 %v863_v57, %v863_v57 }
 0x968   :  { %v867_v61 = vsel %vm48_vm1, %v865_v60, 0.0  ;;  %v866_v62 = vmul.f32 %v864_v59, %v864_v59 }
 0x969   :  { %868 = vadd.xlane.f32.xlu0 %v867_v61 }
 0x96a   :  { %v870_v63 = vsel %vm48_vm1, %v866_v62, 0.0 }
 0x96b   :  { %871 = vadd.xlane.f32.xlu1 %v870_v63 }
 0x9f6   :  { %v869_v5 = vpop.xlane.xlu0 %868 }
 0x9f7   :  { %v873_v6 = vmul.f32 0.03125, %v869_v5 }
 0x9f8   :  { %v872_v8 = vpop.xlane.xlu1 %871 }
 0x9f9   :  { %v875_v10 = vadd.f32 1e-05, %v873_v6  ;;  %v874_v11 = vmul.f32 0.03125, %v872_v8 }
 0x9fb   :  { %1110 = vrsqrt.f32 %v875_v10  ;;  %v876_v3 = vadd.f32 1e-05, %v874_v11 }
 0x9fd   :  { %1112 = vrsqrt.f32 %v876_v3 }
 0xa05   :  { %v1111_v14 = vpop.eup %1110 }
 0xa06   :  { %v879_v15 = vmul.f32 %v1111_v14, %v863_v57 }
 0xa07   :  { %v1113_v18 = vpop.eup %1112 }
 0xa08   :  { %v880_v19 = vmul.f32 %v1113_v18, %v864_v59  ;;  %v885_v20 = vmul.f32 %v884_v13, %v879_v15 }
 0xa0a   :  { %v886_v21 = vmul.f32 %v884_v13, %v880_v19  ;;  %v891_v22 = vadd.f32 %v890_v16, %v885_v20 }
 0xa0c   :  { %v892_v23 = vadd.f32 %v890_v16, %v886_v21  ;;  %893 = vst.msk [vmem:[#allocation3] sm:$0xff] %vm48_vm1, %v891_v22 }
 0xa0e   :  { %894 = vst.msk [vmem:[#allocation3 + $0x8] sm:$0xff] %vm48_vm1, %v892_v23 }
 0xa0f   :  { %1125 = shalt.err (!%p1122_p4)
}
 0xa10   :  { %s1126_s7 = scalar_lea.hbm %s1389_s5, 256 }
 0xa11   :  { %p1127_p5 = scmp.ne.s32.totalorder %s1389_s5, %s1126_s7  ;;  %p1130_p6 = scmp.lt.u32.totalorder %s1126_s7, %s1389_s5 }
 0xa13   :  { %p1132_p7 = pnand %p1130_p6, %p1127_p5 }
 0xa15   :  { %1135 = shalt.err (!%p1132_p7)
}
 0xa16   :  { %s1156_s1 = smov 128  }
 0xa17   :  { %906 = dma.vmem_to_hbm [thread:$0]  %s901_s29, 256, %s1389_s5, [#allocation4], %s1156_s1, %s1156_s1, %s1151_s19  }
 0xa18   :  { %1136 = dma.done.wait [#allocation4], 256  }
 0xa19   :  { %1137 = vsyncadd [#allocation4], 4294967040 }
 0xa1a   :  { %910 = vsyncpa [#allocation4], 1 }

</bundles_post_ra>
